<compile_context>
chip_gen: v6e
topology: v6e:2x2x1
jax: 0.10.0
libtpu: 0.0.40
codegen_flags: <defaults>
</compile_context>

<pallas_src>
import math
import functools

import jax
import jax.numpy as jnp
from jax.experimental import pallas as pl
from jax.experimental.pallas import tpu as pltpu

_MASK_VALUE = -1e30  # large finite negative: avoids (-inf) - (-inf) -> NaN on masked rows


def _pick_tile(dim, target, quantum):
    """Largest tile <= target that divides `dim` and is a multiple of `quantum`,
    or the full dim if dim <= target (full-extent blocks are always legal)."""
    if dim <= target:
        return dim
    t = (target // quantum) * quantum
    while t >= quantum:
        if dim % t == 0:
            return t
        t -= quantum
    return dim


# ---------------- in-kernel helpers (traced inside the Pallas bodies) ----------------
def _layernorm_f32(x, gamma, beta, eps=1e-5):
    mu = jnp.mean(x, axis=-1, keepdims=True)
    var = jnp.mean((x - mu) ** 2, axis=-1, keepdims=True)
    return (x - mu) * jax.lax.rsqrt(var + eps) * gamma + beta


def _gelu_tanh(x):
    c = math.sqrt(2.0 / math.pi)
    return 0.5 * x * (1.0 + jnp.tanh(c * (x + 0.044715 * x * x * x)))


# ---------------- kernel 1: LN1 + fused QKV projection (row x qkv-column tiles) ----------------
def ln_qkv_kernel(x_ref, g1_ref, b1_ref, wqkv_ref, bqkv_ref, qkv_ref):
    x = x_ref[...].astype(jnp.float32)                        # (tr, D)
    h = _layernorm_f32(x, g1_ref[...], b1_ref[...])           # f32 elementwise
    h16 = h.astype(jnp.bfloat16)                              # bf16 MXU operand
    acc = jnp.dot(h16, wqkv_ref[...], preferred_element_type=jnp.float32)
    qkv_ref[...] = (acc + bqkv_ref[...]).astype(qkv_ref.dtype)


# ---------------- kernel 2: flash-style causal attention over (B*H, q-tile, kv-tile) ----------------
def flash_attn_kernel(q_ref, k_ref, v_ref, o_ref, m_ref, l_ref, acc_ref, *, t_q, t_k):
    qi = pl.program_id(1)
    ki = pl.program_id(2)
    q_start = qi * t_q
    k_start = ki * t_k

    @pl.when(ki == 0)
    def _init():
        m_ref[...] = jnp.full(m_ref.shape, _MASK_VALUE, jnp.float32)
        l_ref[...] = jnp.zeros(l_ref.shape, jnp.float32)
        acc_ref[...] = jnp.zeros(acc_ref.shape, jnp.float32)

    # Causal block skip: KV blocks entirely in the future contribute nothing.
    @pl.when(k_start <= q_start + (t_q - 1))
    def _compute():
        q = q_ref[0]                                          # (t_q, hs) bf16; scale pre-folded
        k = k_ref[0]                                          # (t_k, hs) bf16
        v = v_ref[0]                                          # (t_k, hs) bf16
        # q @ k^T via dot_general (contract last dims) -> no explicit transpose.
        s = jax.lax.dot_general(q, k, (((1,), (1,)), ((), ())),
                                preferred_element_type=jnp.float32)   # (t_q, t_k) f32
        q_pos = q_start + jax.lax.broadcasted_iota(jnp.int32, (t_q, t_k), 0)
        k_pos = k_start + jax.lax.broadcasted_iota(jnp.int32, (t_q, t_k), 1)
        s = jnp.where(q_pos >= k_pos, s, _MASK_VALUE)

        m_prev = m_ref[...]
        m_new = jnp.maximum(m_prev, jnp.max(s, axis=-1, keepdims=True))
        alpha = jnp.exp(m_prev - m_new)
        p = jnp.exp(s - m_new)
        l_ref[...] = alpha * l_ref[...] + jnp.sum(p, axis=-1, keepdims=True)
        acc_ref[...] = alpha * acc_ref[...] + jnp.dot(
            p.astype(jnp.bfloat16), v, preferred_element_type=jnp.float32)
        m_ref[...] = m_new

    @pl.when(ki == pl.num_programs(2) - 1)
    def _finalize():
        inv_l = pl.reciprocal(l_ref[...], approx=True)        # EUP, not VPU divide
        o_ref[0] = (acc_ref[...] * inv_l).astype(o_ref.dtype)


# ---------------- kernel 3: out-proj + residual + LN2 + hidden-tiled MLP + residual ----------------
def proj_mlp_kernel(x_ref, ctx_ref, wo_ref, bo_ref, g2_ref, b2_ref,
                    wup_ref, bup_ref, wdn_ref, bdn_ref, o_ref,
                    acc_ref, h2_ref):
    j = pl.program_id(1)          # MLP hidden tile index (reduction axis, "arbitrary")

    @pl.when(j == 0)
    def _init():
        x = x_ref[...].astype(jnp.float32)
        attn = jnp.dot(ctx_ref[...], wo_ref[...],
                       preferred_element_type=jnp.float32) + bo_ref[...]
        x1 = x + attn                                         # first residual (f32)
        h2 = _layernorm_f32(x1, g2_ref[...], b2_ref[...])
        h2_ref[...] = h2.astype(jnp.bfloat16)                 # reused across hidden tiles
        acc_ref[...] = x1 + bdn_ref[...]                      # second residual + bdn folded in

    up = jnp.dot(h2_ref[...], wup_ref[...],
                 preferred_element_type=jnp.float32) + bup_ref[...]   # (tr, th) f32
    up = _gelu_tanh(up)                                       # f32 elementwise
    acc_ref[...] += jnp.dot(up.astype(jnp.bfloat16), wdn_ref[...],
                            preferred_element_type=jnp.float32)

    @pl.when(j == pl.num_programs(1) - 1)
    def _finalize():
        o_ref[...] = acc_ref[...].astype(o_ref.dtype)


# ---------------- wrapper ----------------
def transformer_decoder_block(x, params, *, n_heads,
                              row_tile_target=256, qkv_col_tile_target=512,
                              mlp_hidden_tile_target=512, seq_tile_target=256):
    (g1, be1, wqkv, bqkv, wo, bo, g2, be2, wup, bup, wdn, bdn) = params
    B, T, D = x.shape
    assert D % n_heads == 0
    hs = D // n_heads
    N = B * T

    # Fold the 1/sqrt(head_size) attention scale into the Q columns of Wqkv/bqkv (free).
    scale = 1.0 / math.sqrt(hs)
    wqkv = wqkv.at[:, :D].multiply(scale)
    bqkv = bqkv.at[:, :D].multiply(scale)

    # bf16 weights in HBM -> bf16 MXU operands (f32 accumulation happens in-kernel).
    wqkv16 = wqkv.astype(jnp.bfloat16)
    wo16 = wo.astype(jnp.bfloat16)
    wup16 = wup.astype(jnp.bfloat16)
    wdn16 = wdn.astype(jnp.bfloat16)

    x_flat = x.reshape(N, D)

    tr = _pick_tile(N, row_tile_target, 8)               # token-row tile (MXU M fill)
    tc = _pick_tile(3 * D, qkv_col_tile_target, 128)     # QKV output-column tile
    th = _pick_tile(4 * D, mlp_hidden_tile_target, 128)  # MLP hidden tile (no (T,4D) tensor)
    tq = _pick_tile(T, seq_tile_target, 8)               # attention q/kv tile
    tk = tq
    # Note: weights are revisited every step (constant index_map) so Pallas keeps them
    # resident; single-buffering them (pipeline_mode=pl.Buffered(1)) + vmem_limit_bytes
    # can further halve their VMEM footprint on v7x (64 MiB/TC).

    # ---- kernel 1: LN1 + QKV projection ----
    qkv = pl.pallas_call(
        ln_qkv_kernel,
        out_shape=jax.ShapeDtypeStruct((N, 3 * D), jnp.bfloat16),
        grid_spec=pltpu.PrefetchScalarGridSpec(
            num_scalar_prefetch=0,
            grid=(N // tr, (3 * D) // tc),
            in_specs=[
                pl.BlockSpec((tr, D), lambda i, j: (i, 0)),   # x rows
                pl.BlockSpec((1, D), lambda i, j: (0, 0)),    # gamma1
                pl.BlockSpec((1, D), lambda i, j: (0, 0)),    # beta1
                pl.BlockSpec((D, tc), lambda i, j: (0, j)),   # Wqkv column tile
                pl.BlockSpec((1, tc), lambda i, j: (0, j)),   # bqkv column tile
            ],
            out_specs=pl.BlockSpec((tr, tc), lambda i, j: (i, j)),
        ),
        compiler_params=pltpu.CompilerParams(
            dimension_semantics=("parallel", "parallel")),
    )(x_flat, g1, be1, wqkv16, bqkv)

    # Head split (one-time XLA relayout; matches .view(B,T,H,hs).transpose(1,2)).
    qkv5 = qkv.reshape(B, T, 3, n_heads, hs)
    q = qkv5[:, :, 0].transpose(0, 2, 1, 3).reshape(B * n_heads, T, hs)
    k = qkv5[:, :, 1].transpose(0, 2, 1, 3).reshape(B * n_heads, T, hs)
    v = qkv5[:, :, 2].transpose(0, 2, 1, 3).reshape(B * n_heads, T, hs)

    # ---- kernel 2: flash-style causal attention ----
    ctx = pl.pallas_call(
        functools.partial(flash_attn_kernel, t_q=tq, t_k=tk),
        out_shape=jax.ShapeDtypeStruct((B * n_heads, T, hs), jnp.bfloat16),
        grid_spec=pltpu.PrefetchScalarGridSpec(
            num_scalar_prefetch=0,
            grid=(B * n_heads, T // tq, T // tk),
            in_specs=[
                pl.BlockSpec((1, tq, hs), lambda b, qi, ki: (b, qi, 0)),
                pl.BlockSpec((1, tk, hs), lambda b, qi, ki: (b, ki, 0)),
                pl.BlockSpec((1, tk, hs), lambda b, qi, ki: (b, ki, 0)),
            ],
            out_specs=pl.BlockSpec((1, tq, hs), lambda b, qi, ki: (b, qi, 0)),
            scratch_shapes=[
                pltpu.VMEM((tq, 1), jnp.float32),   # running max m
                pltpu.VMEM((tq, 1), jnp.float32),   # running denom l
                pltpu.VMEM((tq, hs), jnp.float32),  # f32 accumulator
            ],
        ),
        compiler_params=pltpu.CompilerParams(
            dimension_semantics=("parallel", "parallel", "arbitrary")),
    )(q, k, v)

    ctx_flat = ctx.reshape(B, n_heads, T, hs).transpose(0, 2, 1, 3).reshape(N, D)

    # ---- kernel 3: output projection + residual + LN2 + MLP (hidden-tiled) + residual ----
    out_flat = pl.pallas_call(
        proj_mlp_kernel,
        out_shape=jax.ShapeDtypeStruct((N, D), jnp.float32),
        grid_spec=pltpu.PrefetchScalarGridSpec(
            num_scalar_prefetch=0,
            grid=(N // tr, (4 * D) // th),
            in_specs=[
                pl.BlockSpec((tr, D), lambda i, j: (i, 0)),   # x rows (residual)
                pl.BlockSpec((tr, D), lambda i, j: (i, 0)),   # attention context rows
                pl.BlockSpec((D, D), lambda i, j: (0, 0)),    # Wo
                pl.BlockSpec((1, D), lambda i, j: (0, 0)),    # bo
                pl.BlockSpec((1, D), lambda i, j: (0, 0)),    # gamma2
                pl.BlockSpec((1, D), lambda i, j: (0, 0)),    # beta2
                pl.BlockSpec((D, th), lambda i, j: (0, j)),   # Wup hidden tile
                pl.BlockSpec((1, th), lambda i, j: (0, j)),   # bup hidden tile
                pl.BlockSpec((th, D), lambda i, j: (j, 0)),   # Wdn hidden tile
                pl.BlockSpec((1, D), lambda i, j: (0, 0)),    # bdn
            ],
            out_specs=pl.BlockSpec((tr, D), lambda i, j: (i, 0)),
            scratch_shapes=[
                pltpu.VMEM((tr, D), jnp.float32),    # accumulator (x1 + bdn + sum_j ...)
                pltpu.VMEM((tr, D), jnp.bfloat16),   # cached LN2(x1)
            ],
        ),
        compiler_params=pltpu.CompilerParams(
            dimension_semantics=("parallel", "arbitrary")),
    )(x_flat, ctx_flat, wo16, bo, g2, be2, wup16, bup, wdn16, bdn)

    return out_flat.reshape(B, T, D)


# ---------------- pure-JAX reference (f32) for a sanity check ----------------
def reference_block(x, params, *, n_heads):
    (g1, be1, wqkv, bqkv, wo, bo, g2, be2, wup, bup, wdn, bdn) = params
    B, T, D = x.shape
    hs = D // n_heads

    def ln(z, g, b):
        mu = z.mean(-1, keepdims=True)
        var = ((z - mu) ** 2).mean(-1, keepdims=True)
        return (z - mu) / jnp.sqrt(var + 1e-5) * g[0] + b[0]

    h = ln(x, g1, be1)
    qkv = h @ wqkv + bqkv[0]
    q, k, v = jnp.split(qkv, 3, axis=-1)
    q = q.reshape(B, T, n_heads, hs).transpose(0, 2, 1, 3)
    k = k.reshape(B, T, n_heads, hs).transpose(0, 2, 1, 3)
    v = v.reshape(B, T, n_heads, hs).transpose(0, 2, 1, 3)
    s = jnp.einsum("bhtd,bhsd->bhts", q, k) / math.sqrt(hs)
    mask = jnp.tril(jnp.ones((T, T), bool))
    s = jnp.where(mask, s, -jnp.inf)
    p = jax.nn.softmax(s, axis=-1)
    ctx = jnp.einsum("bhts,bhsd->bhtd", p, v).transpose(0, 2, 1, 3).reshape(B, T, D)
    x1 = x + (ctx @ wo + bo[0])
    h2 = ln(x1, g2, be2)
    up = h2 @ wup + bup[0]
    up = 0.5 * up * (1.0 + jnp.tanh(math.sqrt(2.0 / math.pi) * (up + 0.044715 * up ** 3)))
    return x1 + (up @ wdn + bdn[0])


if __name__ == "__main__":
    # Small GPT config: B=2, context T=8, d_embed=32, n_heads=4
    B, T, D, H = 2, 8, 32, 4
    key = jax.random.PRNGKey(0)
    ks = jax.random.split(key, 8)

    x = jax.random.normal(ks[0], (B, T, D), dtype=jnp.float32)

    g1 = jnp.ones((1, D), jnp.float32)
    be1 = jnp.zeros((1, D), jnp.float32)
    wqkv = 0.02 * jax.random.normal(ks[1], (D, 3 * D), jnp.float32)
    bqkv = jnp.zeros((1, 3 * D), jnp.float32)
    wo = 0.02 * jax.random.normal(ks[2], (D, D), jnp.float32)
    bo = jnp.zeros((1, D), jnp.float32)
    g2 = jnp.ones((1, D), jnp.float32)
    be2 = jnp.zeros((1, D), jnp.float32)
    wup = 0.02 * jax.random.normal(ks[3], (D, 4 * D), jnp.float32)
    bup = jnp.zeros((1, 4 * D), jnp.float32)
    wdn = 0.02 * jax.random.normal(ks[4], (4 * D, D), jnp.float32)
    bdn = jnp.zeros((1, D), jnp.float32)

    params = (g1, be1, wqkv, bqkv, wo, bo, g2, be2, wup, bup, wdn, bdn)

    out = transformer_decoder_block(x, params, n_heads=H)
    out = jax.block_until_ready(out)

    ref = reference_block(x, params, n_heads=H)
    assert out.shape == (B, T, D)
    # bf16 matmul operands (f32 accumulation) -> compare against the f32 reference loosely.
    assert jnp.allclose(out, ref, atol=1e-2, rtol=1e-2), "mismatch vs JAX reference"

    print("KERNEL_OK")
</pallas_src>

<mosaic_0001>
module attributes {stable_mosaic.version = 11 : i64} {
  func.func @ln_qkv_kernel(%arg0: i32, %arg1: i32, %arg2: memref<16x32xf32, #tpu.memory_space<vmem>>, %arg3: memref<1x32xf32, #tpu.memory_space<vmem>>, %arg4: memref<1x32xf32, #tpu.memory_space<vmem>>, %arg5: memref<32x96xbf16, #tpu.memory_space<vmem>>, %arg6: memref<1x96xf32, #tpu.memory_space<vmem>>, %arg7: memref<16x96xbf16, #tpu.memory_space<vmem>>) attributes {dimension_semantics = [#tpu.dimension_semantics<parallel>, #tpu.dimension_semantics<parallel>], iteration_bounds = array<i64: 1, 1>, scalar_prefetch = 0 : i64, scratch_operands = 0 : i64, tpu.core_type = #tpu.core_type<tc>, window_params = [{transform_indices = @transform_0, window_bounds = array<i64: 16, 32>}, {pipeline_mode = #tpu.pipeline_mode<synchronous>, transform_indices = @transform_1, window_bounds = array<i64: 1, 32>}, {pipeline_mode = #tpu.pipeline_mode<synchronous>, transform_indices = @transform_2, window_bounds = array<i64: 1, 32>}, {transform_indices = @transform_3, window_bounds = array<i64: 32, 96>}, {transform_indices = @transform_4, window_bounds = array<i64: 1, 96>}, {transform_indices = @transform_5, window_bounds = array<i64: 16, 96>}]} {
    %c0 = arith.constant 0 : index
    %c0_0 = arith.constant 0 : index
    %0 = vector.load %arg2[%c0, %c0_0] : memref<16x32xf32, #tpu.memory_space<vmem>>, vector<16x32xf32>
    %c0_1 = arith.constant 0 : index
    %c0_2 = arith.constant 0 : index
    %1 = vector.load %arg3[%c0_1, %c0_2] : memref<1x32xf32, #tpu.memory_space<vmem>>, vector<1x32xf32>
    %c0_3 = arith.constant 0 : index
    %c0_4 = arith.constant 0 : index
    %2 = vector.load %arg4[%c0_3, %c0_4] : memref<1x32xf32, #tpu.memory_space<vmem>>, vector<1x32xf32>
    %cst = arith.constant dense<0.000000e+00> : vector<16xf32>
    %3 = vector.multi_reduction <add>, %0, %cst [1] : vector<16x32xf32> to vector<16xf32>
    %4 = vector.shape_cast %3 : vector<16xf32> to vector<16x1xf32>
    %cst_5 = arith.constant 3.200000e+01 : f32
    %5 = vector.broadcast %cst_5 : f32 to vector<16x1xf32>
    %6 = arith.divf %4, %5 : vector<16x1xf32>
    %7 = vector.broadcast %6 : vector<16x1xf32> to vector<16x32xf32>
    %8 = arith.subf %0, %7 : vector<16x32xf32>
    %9 = arith.mulf %8, %8 : vector<16x32xf32>
    %cst_6 = arith.constant dense<0.000000e+00> : vector<16xf32>
    %10 = vector.multi_reduction <add>, %9, %cst_6 [1] : vector<16x32xf32> to vector<16xf32>
    %11 = vector.shape_cast %10 : vector<16xf32> to vector<16x1xf32>
    %cst_7 = arith.constant 3.200000e+01 : f32
    %12 = vector.broadcast %cst_7 : f32 to vector<16x1xf32>
    %13 = arith.divf %11, %12 : vector<16x1xf32>
    %14 = vector.broadcast %6 : vector<16x1xf32> to vector<16x32xf32>
    %15 = arith.subf %0, %14 : vector<16x32xf32>
    %cst_8 = arith.constant 9.99999974E-6 : f32
    %16 = vector.broadcast %cst_8 : f32 to vector<16x1xf32>
    %17 = arith.addf %13, %16 : vector<16x1xf32>
    %18 = math.rsqrt %17 : vector<16x1xf32>
    %19 = vector.broadcast %18 : vector<16x1xf32> to vector<16x32xf32>
    %20 = arith.mulf %15, %19 : vector<16x32xf32>
    %21 = vector.broadcast %1 : vector<1x32xf32> to vector<16x32xf32>
    %22 = arith.mulf %20, %21 : vector<16x32xf32>
    %23 = vector.broadcast %2 : vector<1x32xf32> to vector<16x32xf32>
    %24 = arith.addf %22, %23 : vector<16x32xf32>
    %25 = arith.truncf %24 : vector<16x32xf32> to vector<16x32xbf16>
    %c0_9 = arith.constant 0 : index
    %c0_10 = arith.constant 0 : index
    %26 = vector.load %arg5[%c0_9, %c0_10] : memref<32x96xbf16, #tpu.memory_space<vmem>>, vector<32x96xbf16>
    %cst_11 = arith.constant dense<0.000000e+00> : vector<16x96xf32>
    %27 = tpu.matmul %25, %26, %cst_11 {dimension_numbers = #tpu.dot_dimension_numbers<[1], [0], [0], [1], [0, 0, 1, 1], [], []>} : vector<16x32xbf16>, vector<32x96xbf16>, vector<16x96xf32> -> vector<16x96xf32>
    %c0_12 = arith.constant 0 : index
    %c0_13 = arith.constant 0 : index
    %28 = vector.load %arg6[%c0_12, %c0_13] : memref<1x96xf32, #tpu.memory_space<vmem>>, vector<1x96xf32>
    %29 = vector.broadcast %28 : vector<1x96xf32> to vector<16x96xf32>
    %30 = arith.addf %27, %29 : vector<16x96xf32>
    %31 = arith.truncf %30 : vector<16x96xf32> to vector<16x96xbf16>
    %c0_14 = arith.constant 0 : index
    %c0_15 = arith.constant 0 : index
    %32 = vector.load %arg7[%c0_14, %c0_15] : memref<16x96xbf16, #tpu.memory_space<vmem>>, vector<16x96xbf16>
    tpu.vector_store %arg7[%c0_14, %c0_15], %31 {strides = array<i32>} : memref<16x96xbf16, #tpu.memory_space<vmem>>, vector<16x96xbf16>,
    return
  }
  func.func @transform_0(%arg0: i32, %arg1: i32) -> (i32, i32) {
    %c0_i32 = arith.constant 0 : i32
    %c0_i32_0 = arith.constant 0 : i32
    return %arg0, %c0_i32 : i32, i32
  }
  func.func @transform_1(%arg0: i32, %arg1: i32) -> (i32, i32) {
    %c0_i32 = arith.constant 0 : i32
    %c0_i32_0 = arith.constant 0 : i32
    %c0_i32_1 = arith.constant 0 : i32
    return %c0_i32, %c0_i32_0 : i32, i32
  }
  func.func @transform_2(%arg0: i32, %arg1: i32) -> (i32, i32) {
    %c0_i32 = arith.constant 0 : i32
    %c0_i32_0 = arith.constant 0 : i32
    %c0_i32_1 = arith.constant 0 : i32
    return %c0_i32, %c0_i32_0 : i32, i32
  }
  func.func @transform_3(%arg0: i32, %arg1: i32) -> (i32, i32) {
    %c0_i32 = arith.constant 0 : i32
    %c0_i32_0 = arith.constant 0 : i32
    return %c0_i32, %arg1 : i32, i32
  }
  func.func @transform_4(%arg0: i32, %arg1: i32) -> (i32, i32) {
    %c0_i32 = arith.constant 0 : i32
    %c0_i32_0 = arith.constant 0 : i32
    return %c0_i32, %arg1 : i32, i32
  }
  func.func @transform_5(%arg0: i32, %arg1: i32) -> (i32, i32) {
    %c0_i32 = arith.constant 0 : i32
    return %arg0, %arg1 : i32, i32
  }
}

</mosaic_0001>

<bundles_post_ra>
// kernel: tpu_custom_call.1
= control target key start
LH: loop header
LB: loop body
LE: loop exit
PB: predicated region body
PF: predicated region fallthrough
CT: control target
= control target key end

     0   :  { %10 = vsyncpa [#allocation3], 0  ;;  %s365_s0 = inlined_call_operand.hbm [shape: f32[16,32], index: 0, kind: input, shape index: {}]   ;;  %s366_s1 = inlined_call_operand.vmem [shape: f32[1,32], index: 1, kind: input, shape index: {}]   ;;  %s367_s2 = inlined_call_operand.vmem [shape: f32[1,32], index: 2, kind: input, shape index: {}]   ;;  %s368_s3 = inlined_call_operand.hbm [shape: bf16[32,96], index: 3, kind: input, shape index: {}]   ;;  %s369_s4 = inlined_call_operand.vmem [shape: f32[1,96], index: 4, kind: input, shape index: {}]   ;;  %s370_s5 = inlined_call_operand.hbm [shape: bf16[16,96], index: 5, kind: output, shape index: {}]  }
   0x1   :  { %11 = vsyncpa [#allocation6], 0 }
   0x2   :  { %12 = vsyncpa [#allocation4], 0  ;;  %s297_s18 = smov [#allocation2]  }
   0x3   :  { %s18_s19 = sshll.u32 %s297_s18, 4  ;;  %s19_s19 = int_to_ptr.vmem [resolvable:$true] %s18_s19 }
   0x4   :  { %s239_s20 = scalar_lea.vmem %s19_s19, 256  ;;  %p244_p1 = scmp.lt.s32.totalorder %s19_s19, %s19_s19 }
   0x5   :  { %p240_p0 = scmp.ne.s32.totalorder %s19_s19, %s239_s20  ;;  %p245_p2 = scmp.lt.s32.totalorder %s239_s20, %s239_s20 }
   0x7   :  { %p246_p3 = por %p245_p2, %p244_p1 }
   0x9   :  { %p247_p4 = pnand %p246_p3, %p240_p0 }
   0xb   :  { %250 = shalt.err (!%p247_p4)
}
   0xc   :  { %s298_s21 = smov 128   ;;  %s299_s22 = smov 8  }
   0xd   :  { %24 = dma.hbm_to_vmem [thread:$0]  %s365_s0, 256, %s19_s19, [#allocation3], %s298_s21, %s298_s21, %s299_s22  }
   0xe   :  { %s300_s25 = smov [#allocation5]  }
   0xf   :  { %s34_s26 = sshll.u32 %s300_s25, 4  ;;  %s35_s26 = int_to_ptr.vmem [resolvable:$true] %s34_s26 }
  0x10   :  { %s259_s27 = scalar_lea.vmem %s35_s26, 256  ;;  %p264_p6 = scmp.lt.s32.totalorder %s35_s26, %s35_s26 }
  0x11   :  { %p260_p5 = scmp.ne.s32.totalorder %s35_s26, %s259_s27  ;;  %p265_p7 = scmp.lt.s32.totalorder %s259_s27, %s259_s27 }
  0x13   :  { %p266_p8 = por %p265_p7, %p264_p6 }
  0x15   :  { %p267_p9 = pnand %p266_p8, %p260_p5 }
  0x17   :  { %270 = shalt.err (!%p267_p9)
}
  0x18   :  { %s301_s28 = smov 64   ;;  %s302_s29 = smov 4  }
  0x19   :  { %40 = dma.hbm_to_vmem [thread:$0]  %s368_s3, 256, %s35_s26, [#allocation6], %s301_s28, %s301_s28, %s302_s29  }
  0x1a   :  { %291 = dma.done.wait [#allocation3], 256  }
  0x1b   :  { %292 = vsyncadd [#allocation3], 4294967040 }
  0x1c   :  { %293 = dma.done.wait [#allocation6], 256  }
  0x1d   :  { %294 = vsyncadd [#allocation6], 4294967040  ;;  %vm54_vm0 = vcmask 261120   ;;  %v50_v0 = vld [vmem:[#allocation2] sm:$0xff]  ;;  %v51_v1 = vld [vmem:[#allocation2 + $0x8] sm:$0xff]  ;;  %v303_v15 = vmov 0.0  }
  0x1e   :  { %v55_v2 = vsel %vm54_vm0, %v50_v0, 0.0  ;;  %v58_v3 = vsel %vm54_vm0, %v51_v1, 0.0  ;;  %v225_v14 = vld [vmem:[#allocation5 + $0x8] sm:$0xff]   ;;  %208 = vmatprep.subr.bf16.mxu0 %v303_v15  ;;  %vm304_vm1 = vmmov 0   ;;  %v226_v16 = vld [vmem:[#allocation5] sm:$0xff]   ;;  %vm174_vm2 = vcmask 781312  }
  0x1f   :  { %56 = vadd.xlane.f32.xlu0 %v55_v2  ;;  %212 = vmatprep.mubr.msk.bf16.mxu0 %vm304_vm1, %v303_v15  ;;  %v195_v25 = vld [vmem:[%s366_s1] ss:$0 sm:$0xff]  ;;  %s305_s1 = smov [#allocation7]  }
  0x20   :  { %209 = vmatpush3.bf16.msra.mxu0 %v225_v14  ;;  %v196_v29 = vld [vmem:[%s367_s2] ss:$0 sm:$0xff]  ;;  %s182_s11 = sshll.u32 %s305_s1, 4  ;;  %s183_s11 = int_to_ptr.vmem [resolvable:$true] %s182_s11 }
  0x21   :  { %210 = vmatprep.subr.bf16.mxu0 %v303_v15  ;;  %v197_v34 = vld [vmem:[%s369_s4] ss:$0 sm:$0xff]  ;;  %s271_s2 = scalar_lea.vmem %s183_s11, 128  ;;  %p276_p11 = scmp.lt.s32.totalorder %s183_s11, %s183_s11 }
  0x22   :  { %p272_p10 = scmp.ne.s32.totalorder %s183_s11, %s271_s2  ;;  %p277_p12 = scmp.lt.s32.totalorder %s271_s2, %s271_s2 }
  0x23   :  { %59 = vadd.xlane.f32.xlu0 %v58_v3 }
  0x24   :  { %211 = vmatpush3.bf16.msra.mxu0 %v226_v16  ;;  %p278_p13 = por %p277_p12, %p276_p11 }
  0x26   :  { %p279_p0 = pnand %p278_p13, %p272_p10 }
  0xa8   :  { %v57_v4 = vpop.xlane.xlu0 %56 }
  0xa9   :  { %v62_v5 = vmul.f32 0.03125, %v57_v4 }
  0xab   :  { %v64_v6 = vsub.f32 %v50_v0, %v62_v5 }
  0xac   :  { %v60_v7 = vpop.xlane.xlu0 %59 }
  0xad   :  { %v63_v8 = vmul.f32 0.03125, %v60_v7  ;;  %v66_v9 = vmul.f32 %v64_v6, %v64_v6 }
  0xaf   :  { %v65_v10 = vsub.f32 %v51_v1, %v63_v8  ;;  %v68_v11 = vsel %vm54_vm0, %v66_v9, 0.0 }
  0xb0   :  { %69 = vadd.xlane.f32.xlu1 %v68_v11 }
  0xb1   :  { %v67_v12 = vmul.f32 %v65_v10, %v65_v10 }
  0xb3   :  { %v71_v13 = vsel %vm54_vm0, %v67_v12, 0.0 }
  0xb4   :  { %72 = vadd.xlane.f32.xlu1 %v71_v13 }
 0x139   :  { %v70_v17 = vpop.xlane.xlu1 %69 }
 0x13a   :  { %v74_v18 = vmul.f32 0.03125, %v70_v17 }
 0x13c   :  { %v76_v19 = vadd.f32 1e-05, %v74_v18 }
 0x13d   :  { %v73_v20 = vpop.xlane.xlu1 %72 }
 0x13e   :  { %227 = vrsqrt.f32 %v76_v19  ;;  %v75_v21 = vmul.f32 0.03125, %v73_v20 }
 0x140   :  { %v77_v22 = vadd.f32 1e-05, %v75_v21 }
 0x142   :  { %229 = vrsqrt.f32 %v77_v22 }
 0x14b   :  { %v228_v23 = vpop.eup %227 }
 0x14c   :  { %v80_v24 = vmul.f32 %v228_v23, %v64_v6 }
 0x14e   :  { %v88_v28 = vmul.f32 %v195_v25, %v80_v24 }
 0x14f   :  { %v230_v26 = vpop.eup %229 }
 0x150   :  { %v81_v27 = vmul.f32 %v230_v26, %v65_v10  ;;  %v96_v31 = vadd.f32 %v196_v29, %v88_v28 }
 0x152   :  { %v89_v30 = vmul.f32 %v195_v25, %v81_v27 }
 0x154   :  { %v97_v32 = vadd.f32 %v196_v29, %v89_v30 }
 0x156   :  { %v98_v33 = vpack.c.bf16 %v97_v32, %v96_v31 }
 0x158   :  { %213 = vmatmul.mubr.msk.bf16.vlgmr.msra.gmra.mxu0 %vm54_vm0, %v98_v33 }
 0x218   :  { %v159_v35 = vpop.f32.mrf.mxu0 }
 0x219   :  { %v160_v36 = vadd.f32 %v197_v34, %v159_v35 }
 0x21a   :  { %v214_v37 = vpop.f32.mrf.mxu0 }
 0x21b   :  { %v203_v38 = vpack.c.bf16 %v160_v36, %v160_v36 }
 0x21c   :  { %v162_v39 = vpop.f32.mrf.mxu0 }
 0x21d   :  { %v163_v40 = vadd.f32 %v197_v34, %v162_v39  ;;  %175 = vst.msk [vmem:[#allocation7] sm:$0xf] %vm174_vm2, %v203_v38 }
 0x21e   :  { %v215_v41 = vpop.f32.mrf.mxu0 }
 0x21f   :  { %v204_v42 = vpack.c.bf16 %v163_v40, %v163_v40 }
 0x221   :  { %176 = vst.msk [vmem:[#allocation7 + $0x4] sm:$0xf] %vm174_vm2, %v204_v42 }
 0x222   :  { %282 = shalt.err (!%p279_p0)
}
 0x223   :  { %188 = dma.vmem_to_hbm [thread:$0]  %s183_s11, 128, %s370_s5, [#allocation4], %s301_s28, %s301_s28, %s302_s29  }
 0x224   :  { %295 = dma.done.wait [#allocation4], 128  }
 0x225   :  { %296 = vsyncadd [#allocation4], 4294967168 }
 0x226   :  { %192 = vsyncpa [#allocation3], 1 }
 0x227   :  { %193 = vsyncpa [#allocation6], 1 }
 0x228   :  { %194 = vsyncpa [#allocation4], 1 }

</bundles_post_ra>
